<compile_context>
chip_gen: v5e
topology: v5e:2x2
jax: 0.10.0
libtpu: 0.0.40
codegen_flags: <defaults>
</compile_context>

<pallas_src>
import math

import jax
import jax.numpy as jnp
from jax.experimental import pallas as pl
from jax.experimental.pallas import tpu as pltpu


def _make_dma_copy_kernel(n_chunks: int, rows_per_chunk: int):
    """Kernel that copies an HBM-resident (B, F) array to the output with
    `n_chunks` independent HBM->HBM DMAs along the batch dimension."""

    def kernel(x_ref, o_ref, sem):
        copies = []
        # Issue all DMAs first so they overlap, then wait on each.
        for c in range(n_chunks):
            start = c * rows_per_chunk  # static Python int -> aligned slice
            cp = pltpu.make_async_copy(
                x_ref.at[pl.ds(start, rows_per_chunk)],
                o_ref.at[pl.ds(start, rows_per_chunk)],
                sem.at[c],
            )
            cp.start()
            copies.append(cp)
        for cp in copies:
            cp.wait()

    return kernel


def _pick_n_chunks(B: int) -> int:
    """A small number of equal row-chunks (divides B) to overlap DMA engines."""
    for c in (8, 4, 2):
        if B % c == 0 and B // c >= 1:
            return c
    return 1


def flatten(x: jax.Array) -> jax.Array:
    """Pallas equivalent of `x.view(x.size(0), -1)` for any rank-N input."""
    B = x.shape[0]
    F = int(math.prod(x.shape[1:])) if x.ndim > 1 else 1

    # Free metadata reshape at the XLA level: the kernel only ever sees a
    # contiguous (B, F) buffer and simply copies it to the output buffer.
    x2d = jnp.reshape(x, (B, F))

    itemsize = jnp.dtype(x.dtype).itemsize
    n_chunks = _pick_n_chunks(B)
    rows_per_chunk = B // n_chunks

    return pl.pallas_call(
        _make_dma_copy_kernel(n_chunks, rows_per_chunk),
        out_shape=jax.ShapeDtypeStruct((B, F), x.dtype),
        # Raw HBM refs on both sides -> no VMEM staging, no tiling constraints.
        in_specs=[pl.BlockSpec(memory_space=pl.ANY)],
        out_specs=pl.BlockSpec(memory_space=pl.ANY),
        scratch_shapes=[pltpu.SemaphoreType.DMA((n_chunks,))],
        compiler_params=pltpu.CompilerParams(
            # No VMEM buffers are used; keep the scoped limit modest so it is
            # safe on every generation (v7x has only 64 MiB physical VMEM).
            vmem_limit_bytes=32 * 1024 * 1024,
        ),
        cost_estimate=pl.CostEstimate(
            flops=0,
            transcendentals=0,
            bytes_accessed=2 * B * F * itemsize,  # pure memory traffic
        ),
    )(x2d)


if __name__ == "__main__":
    key = jax.random.PRNGKey(0)
    # Small NCHW input consistent with the module's forward: (B, C, H, W)
    x = jax.random.normal(key, (2, 4, 16, 16), dtype=jnp.float32)

    out = flatten(x)
    out = jax.block_until_ready(out)

    # Reference: plain reshape (what torch .view(B, -1) does on contiguous NCHW)
    ref = x.reshape(x.shape[0], -1)
    assert out.shape == (2, 4 * 16 * 16), out.shape
    assert out.dtype == x.dtype
    assert jnp.array_equal(out, ref), "flatten kernel mismatch"

    print("KERNEL_OK")
</pallas_src>

<mosaic_0001>
module attributes {stable_mosaic.version = 11 : i64} {
  func.func @kernel(%arg0: memref<2x1024xf32, #tpu.memory_space<any>>, %arg1: memref<2x1024xf32, #tpu.memory_space<any>>, %arg2: memref<2x!tpu.dma_semaphore, #tpu.memory_space<semaphore_mem>>) attributes {dimension_semantics = [], scalar_prefetch = 0 : i64, scratch_operands = 1 : i64, tpu.core_type = #tpu.core_type<tc>} {
    %c0_i32 = arith.constant 0 : i32
    %c0_i32_0 = arith.constant 0 : i32
    %c0_i32_1 = arith.constant 0 : i32
    %0 = tpu.memref_slice %arg0[%c0_i32_0, %c0_i32_1] : memref<2x1024xf32, #tpu.memory_space<any>> -> memref<1x1024xf32, #tpu.memory_space<any>>
    %c0_i32_2 = arith.constant 0 : i32
    %c0_i32_3 = arith.constant 0 : i32
    %1 = tpu.memref_slice %arg1[%c0_i32_2, %c0_i32_3] : memref<2x1024xf32, #tpu.memory_space<any>> -> memref<1x1024xf32, #tpu.memory_space<any>>
    %2 = tpu.memref_slice %arg2[%c0_i32] : memref<2x!tpu.dma_semaphore, #tpu.memory_space<semaphore_mem>> -> memref<1x!tpu.dma_semaphore, #tpu.memory_space<semaphore_mem>>
    %3 = tpu.memref_squeeze %2 : memref<1x!tpu.dma_semaphore, #tpu.memory_space<semaphore_mem>> -> memref<!tpu.dma_semaphore, #tpu.memory_space<semaphore_mem>>
    tpu.enqueue_dma source(%0 : memref<1x1024xf32, #tpu.memory_space<any>>) target(%1 : memref<1x1024xf32, #tpu.memory_space<any>>) target_semaphore(%3 : memref<!tpu.dma_semaphore, #tpu.memory_space<semaphore_mem>>)
    %c1_i32 = arith.constant 1 : i32
    %c1_i32_4 = arith.constant 1 : i32
    %c0_i32_5 = arith.constant 0 : i32
    %4 = tpu.memref_slice %arg0[%c1_i32_4, %c0_i32_5] : memref<2x1024xf32, #tpu.memory_space<any>> -> memref<1x1024xf32, #tpu.memory_space<any>>
    %c1_i32_6 = arith.constant 1 : i32
    %c0_i32_7 = arith.constant 0 : i32
    %5 = tpu.memref_slice %arg1[%c1_i32_6, %c0_i32_7] : memref<2x1024xf32, #tpu.memory_space<any>> -> memref<1x1024xf32, #tpu.memory_space<any>>
    %6 = tpu.memref_slice %arg2[%c1_i32] : memref<2x!tpu.dma_semaphore, #tpu.memory_space<semaphore_mem>> -> memref<1x!tpu.dma_semaphore, #tpu.memory_space<semaphore_mem>>
    %7 = tpu.memref_squeeze %6 : memref<1x!tpu.dma_semaphore, #tpu.memory_space<semaphore_mem>> -> memref<!tpu.dma_semaphore, #tpu.memory_space<semaphore_mem>>
    tpu.enqueue_dma source(%4 : memref<1x1024xf32, #tpu.memory_space<any>>) target(%5 : memref<1x1024xf32, #tpu.memory_space<any>>) target_semaphore(%7 : memref<!tpu.dma_semaphore, #tpu.memory_space<semaphore_mem>>)
    %c0_i32_8 = arith.constant 0 : i32
    %c0_i32_9 = arith.constant 0 : i32
    %c0_i32_10 = arith.constant 0 : i32
    %8 = tpu.memref_slice %arg0[%c0_i32_9, %c0_i32_10] : memref<2x1024xf32, #tpu.memory_space<any>> -> memref<1x1024xf32, #tpu.memory_space<any>>
    %c0_i32_11 = arith.constant 0 : i32
    %c0_i32_12 = arith.constant 0 : i32
    %9 = tpu.memref_slice %arg1[%c0_i32_11, %c0_i32_12] : memref<2x1024xf32, #tpu.memory_space<any>> -> memref<1x1024xf32, #tpu.memory_space<any>>
    %10 = tpu.memref_slice %arg2[%c0_i32_8] : memref<2x!tpu.dma_semaphore, #tpu.memory_space<semaphore_mem>> -> memref<1x!tpu.dma_semaphore, #tpu.memory_space<semaphore_mem>>
    %11 = tpu.memref_squeeze %10 : memref<1x!tpu.dma_semaphore, #tpu.memory_space<semaphore_mem>> -> memref<!tpu.dma_semaphore, #tpu.memory_space<semaphore_mem>>
    tpu.wait_dma2 semaphore(%11 : memref<!tpu.dma_semaphore, #tpu.memory_space<semaphore_mem>>) src(%8 : memref<1x1024xf32, #tpu.memory_space<any>>) dst(%9 : memref<1x1024xf32, #tpu.memory_space<any>>)
    %c1_i32_13 = arith.constant 1 : i32
    %c1_i32_14 = arith.constant 1 : i32
    %c0_i32_15 = arith.constant 0 : i32
    %12 = tpu.memref_slice %arg0[%c1_i32_14, %c0_i32_15] : memref<2x1024xf32, #tpu.memory_space<any>> -> memref<1x1024xf32, #tpu.memory_space<any>>
    %c1_i32_16 = arith.constant 1 : i32
    %c0_i32_17 = arith.constant 0 : i32
    %13 = tpu.memref_slice %arg1[%c1_i32_16, %c0_i32_17] : memref<2x1024xf32, #tpu.memory_space<any>> -> memref<1x1024xf32, #tpu.memory_space<any>>
    %14 = tpu.memref_slice %arg2[%c1_i32_13] : memref<2x!tpu.dma_semaphore, #tpu.memory_space<semaphore_mem>> -> memref<1x!tpu.dma_semaphore, #tpu.memory_space<semaphore_mem>>
    %15 = tpu.memref_squeeze %14 : memref<1x!tpu.dma_semaphore, #tpu.memory_space<semaphore_mem>> -> memref<!tpu.dma_semaphore, #tpu.memory_space<semaphore_mem>>
    tpu.wait_dma2 semaphore(%15 : memref<!tpu.dma_semaphore, #tpu.memory_space<semaphore_mem>>) src(%12 : memref<1x1024xf32, #tpu.memory_space<any>>) dst(%13 : memref<1x1024xf32, #tpu.memory_space<any>>)
    return
  }
}

</mosaic_0001>

<bundles_post_ra>
// kernel: tpu_custom_call.1
= control target key start
LH: loop header
LB: loop body
LE: loop exit
PB: predicated region body
PF: predicated region fallthrough
CT: control target
= control target key end

     0   :  { %s76_s12 = smov 32   ;;  %s77_s13 = smov 1   ;;  %s105_s0 = inlined_call_operand.hbm [shape: f32[2,1024], index: 0, kind: input, shape index: {}]   ;;  %s106_s1 = inlined_call_operand.hbm [shape: f32[2,1024], index: 1, kind: output, shape index: {}]  }
   0x1   :  { %s10_s8 = sshll.u32 %s105_s0, 4  ;;  %s12_s11 = sshll.u32 %s106_s1, 4  ;;  %s11_s8 = int_to_ptr.hbm [resolvable:$true] %s10_s8  ;;  %s13_s11 = int_to_ptr.hbm [resolvable:$true] %s12_s11 }
   0x2   :  { %17 = sst [smem:[#allocation4]] %s76_s12  ;;  %s78_s14 = smov [#allocation2]  }
   0x3   :  { %19 = sst [smem:[#allocation4 + $0x1]] %s76_s12  ;;  %s79_s15 = smov [#allocation3]  }
   0x4   :  { %21 = sst [smem:[#allocation4 + $0x2]] %s77_s13  ;;  %s80_s16 = smov 0  }
   0x5   :  { %23 = dma.general %s11_s8, 128, %s13_s11, %s78_s14, %s79_s15, [#allocation4], %s80_s16, 0  }
   0x6   :  { %38 = sst [smem:[#allocation6]] %s76_s12  ;;  %s24_s19 = scalar_lea.hbm %s105_s0, 1 }
   0x7   :  { %40 = sst [smem:[#allocation6 + $0x1]] %s76_s12  ;;  %s25_s22 = scalar_lea.hbm %s106_s1, 1 }
   0x8   :  { %42 = sst [smem:[#allocation6 + $0x2]] %s77_s13  ;;  %s31_s23 = sshll.u32 %s24_s19, 4  ;;  %s32_s23 = int_to_ptr.hbm [resolvable:$true] %s31_s23 }
   0x9   :  { %s33_s24 = sshll.u32 %s25_s22, 4  ;;  %s81_s25 = smov [#allocation2 + $0x1]   ;;  %s34_s24 = int_to_ptr.hbm [resolvable:$true] %s33_s24 }
   0xa   :  { %s82_s26 = smov [#allocation5]  }
   0xb   :  { %44 = dma.general %s32_s23, 128, %s34_s24, %s81_s25, %s82_s26, [#allocation6], %s80_s16, 0  }
   0xc   :  { %72 = dma.done.wait [#allocation2], 128 }
   0xd   :  { %73 = vsyncadd [#allocation2], 4294967168 }
   0xe   :  { %74 = dma.done.wait [#allocation2 + $0x1], 128 }
   0xf   :  { %75 = vsyncadd [#allocation2 + $0x1], 4294967168 }
  0x10   :  { %50 = vsyncmov [#allocation2] }
  0x13   :  { %s51_s27 = vpop.sfrf %50 }
  0x14   :  { %p63_p0 = scmp.ne.s32.totalorder %s51_s27, 0 }
  0x16   :  { %55 = shalt.err (%p63_p0)  }
  0x17   :  { %57 = vsyncmov [#allocation2 + $0x1] }
  0x1a   :  { %s58_s0 = vpop.sfrf %57 }
  0x1b   :  { %p64_p1 = scmp.ne.s32.totalorder %s58_s0, 0 }
  0x1d   :  { %62 = shalt.err (%p64_p1)  }

</bundles_post_ra>
